<compile_context>
chip_gen: v7x
topology: tpu7x:2x2x1
jax: 0.10.0
libtpu: 0.0.40
codegen_flags: <defaults>
</compile_context>

<pallas_src>
import functools

import jax
import jax.numpy as jnp
from jax.experimental import pallas as pl
from jax.experimental.pallas import tpu as pltpu


def _round_up(a, m):
    return -(-a // m) * m


def _shifted1d_kernel(x_ref, hist_ref, w_ref, b_ref, o_ref, head_ref, *,
                      kernel_size, dilation, pad, chunk, use_mxu):
    # x_ref    : (B_blk, C_in, L_tile)   input time tile (auto-pipelined)
    # hist_ref : (B_blk, 1, C_in, padH)  `pad` input cols immediately before the
    #                                    tile (zeros before t=0); precomputed in
    #                                    the wrapper -> no serial carry.
    # w_ref    : (C_out, K*C_in)         w2[o, k*C_in + c] == w[o, c, k]
    # b_ref    : (C_out, 1)
    # o_ref    : (B_blk, C_out, L_tile)
    # head_ref : (C_in, padH + chunk)    tiny scratch, used only for the first
    #                                    chunk of each tile.
    K = kernel_size
    B_blk, C_in, L_tile = x_ref.shape
    C_out = o_ref.shape[1]
    n_ch = L_tile // chunk
    out_dtype = o_ref.dtype

    # Hoisted loop invariants (JAX does not CSE broadcasts inside loops).
    bias_tile = jnp.broadcast_to(b_ref[...].astype(jnp.float32), (C_out, chunk))
    w_val = w_ref[...]
    w_f32 = w_val.astype(jnp.float32)

    def compute(views):
        # views: K arrays (C_in, chunk); views[k][:, u] feeds tap k of column u.
        if use_mxu:
            # Single fused contraction of depth K*C_in -> much better MXU depth
            # utilization than K shallow per-tap matmuls.
            stacked = jnp.concatenate(list(views), axis=0)     # (K*C_in, chunk)
            return bias_tile + jnp.dot(w_val, stacked,
                                       preferred_element_type=jnp.float32)
        # Tiny channel counts: K*C_in broadcast FMAs on the VPU.
        acc = bias_tile
        for k in range(K):
            vk = views[k].astype(jnp.float32)
            for c in range(C_in):
                r = k * C_in + c
                acc = acc + w_f32[:, r:r + 1] * vk[c:c + 1, :]
        return acc

    for b in range(B_blk):
        if pad > 0:
            # Head chunk: the only part that needs the causal history.
            head_ref[:, :pad] = hist_ref[b, 0]
            head_ref[:, pad:pad + chunk] = x_ref[b, :, :chunk]
            views = [head_ref[:, k * dilation:k * dilation + chunk]
                     for k in range(K)]
            o_ref[b, :, :chunk] = compute(views).astype(out_dtype)
            j0 = 1
        else:
            j0 = 0
        # Remaining chunks: taps are statically shifted reads of the input block
        # itself (chunk >= pad is guaranteed whenever n_ch > 1) -- no staging.
        for j in range(j0, n_ch):
            base = j * chunk
            views = [x_ref[b, :, base - (pad - k * dilation):
                           base - (pad - k * dilation) + chunk]
                     for k in range(K)]
            o_ref[b, :, base:base + chunk] = compute(views).astype(out_dtype)


def shifted1d_forward(x, w, b, *, kernel_size, dilation):
    """x: (N, C_in, L), w: (C_out, C_in, K), b: (C_out,) -> (N, C_out, L)."""
    N, C_in, L = x.shape
    C_out, _, K = w.shape
    assert K == kernel_size
    pad = (K - 1) * dilation
    itemsize = x.dtype.itemsize
    LANE = 128

    pad128 = _round_up(max(pad, 1), LANE)
    L128 = _round_up(L, LANE)

    # MXU / VPU crossover (review: ~K*C_in >= 16 on v6e/v7x, lower on v5e).
    use_mxu = (K * C_in >= 16) or (C_out >= 32)

    # Inner compute-chunk width: bounds live f32 temporaries (~128 KiB) so big
    # time tiles don't spill; never below 256 lanes nor below the causal halo.
    live_per_lane = (K * C_in + C_out + C_in) * 4
    chunk0 = max(256, pad128, ((128 * 1024) // live_per_lane) // LANE * LANE)

    def plan(b_blk):
        # Returns (chunk, L_tile, n_t) for a given batch block size.
        if L128 <= chunk0:
            return L128, L128, 1           # single chunk; hist covers any pad
        chunk = chunk0
        max_chunks = max(4, 16 // b_blk)   # bound unrolled code size
        per_lane_io = 2 * b_blk * (C_in + C_out) * itemsize  # double-buffered I/O
        lanes = max(chunk, (12 * 1024 * 1024) // per_lane_io)  # ~12 MiB budget
        lanes = min(lanes, max_chunks * chunk, _round_up(L, chunk))
        l_tile = max(chunk, (lanes // chunk) * chunk)
        n_t = -(-L // l_tile)
        return chunk, l_tile, n_t

    # Pack batch rows per grid step when C_in under-fills the 8 sublanes
    # (v5e/v6e), but only if >= 2 grid programs remain (keep v7x megacore fed).
    B_blk = 1
    if C_in < 8 and N > 1:
        for cand in (8, 4, 2):
            if N % cand != 0 or cand * C_in > 32:
                continue
            _, _, nt_c = plan(cand)
            if (N // cand) * nt_c >= 2:
                B_blk = cand
                break

    chunk, L_tile, n_t = plan(B_blk)
    L_pad = n_t * L_tile
    x_in = x if L_pad == L else jnp.pad(x, ((0, 0), (0, 0), (0, L_pad - L)))

    # Per-tile causal history gathered directly from x (tiny gather); removes
    # the serial cross-tile carry entirely and handles pad > L_tile.
    padH = max(pad, 1)
    if pad > 0:
        pos = (jnp.arange(n_t) * L_tile - pad)[:, None] + jnp.arange(pad)[None, :]
        gathered = jnp.transpose(x[:, :, jnp.clip(pos, 0, L - 1)], (0, 2, 1, 3))
        hist = jnp.where((pos >= 0)[None, :, None, :], gathered,
                         jnp.zeros((), x.dtype))
    else:
        hist = jnp.zeros((N, n_t, C_in, padH), x.dtype)

    # w2[o, k*C_in + c] = w[o, c, k]  (fused-contraction layout).
    w2 = jnp.transpose(w, (0, 2, 1)).reshape(C_out, K * C_in)
    b2 = b.reshape(C_out, 1)

    kernel = functools.partial(_shifted1d_kernel, kernel_size=K,
                               dilation=dilation, pad=pad, chunk=chunk,
                               use_mxu=use_mxu)

    out = pl.pallas_call(
        kernel,
        out_shape=jax.ShapeDtypeStruct((N, C_out, L_pad), x.dtype),
        grid_spec=pltpu.PrefetchScalarGridSpec(
            num_scalar_prefetch=0,
            grid=(N // B_blk, n_t),
            in_specs=[
                pl.BlockSpec((B_blk, C_in, L_tile), lambda nb, t: (nb, 0, t)),
                pl.BlockSpec((B_blk, 1, C_in, padH), lambda nb, t: (nb, t, 0, 0)),
                pl.BlockSpec((C_out, K * C_in), lambda nb, t: (0, 0)),
                pl.BlockSpec((C_out, 1), lambda nb, t: (0, 0)),
            ],
            out_specs=pl.BlockSpec((B_blk, C_out, L_tile),
                                   lambda nb, t: (nb, 0, t)),
            scratch_shapes=[pltpu.VMEM((C_in, padH + chunk), x.dtype)],
        ),
        compiler_params=pltpu.CompilerParams(
            dimension_semantics=("parallel", "parallel"),
            vmem_limit_bytes=32 * 1024 * 1024),
    )(x_in, hist, w2, b2)

    return out if L_pad == L else out[:, :, :L]


def _reference(x, w, b, *, kernel_size, dilation):
    pad = (kernel_size - 1) * dilation
    xp = jnp.pad(x, ((0, 0), (0, 0), (pad, 0)))
    L = x.shape[2]
    out = b[None, :, None]
    for k in range(kernel_size):
        s = k * dilation
        out = out + jnp.einsum('oc,ncl->nol', w[:, :, k], xp[:, :, s:s + L])
    return out


def _run_case(key, N, C_in, C_out, L, kernel_size, dilation):
    kx, kw, kb = jax.random.split(key, 3)
    bound = 1.0 / (C_in * kernel_size) ** 0.5
    x = jax.random.normal(kx, (N, C_in, L), dtype=jnp.float32)
    w = jax.random.uniform(kw, (C_out, C_in, kernel_size),
                           minval=-bound, maxval=bound, dtype=jnp.float32)
    b = jax.random.uniform(kb, (C_out,), minval=-bound, maxval=bound,
                           dtype=jnp.float32)
    out = jax.block_until_ready(
        shifted1d_forward(x, w, b, kernel_size=kernel_size, dilation=dilation))
    ref = _reference(x, w, b, kernel_size=kernel_size, dilation=dilation)
    assert out.shape == (N, C_out, L)
    err = jnp.max(jnp.abs(out - ref))
    assert jnp.allclose(out, ref, atol=1e-4, rtol=1e-4), f"max abs err {err}"


if __name__ == "__main__":
    key = jax.random.PRNGKey(0)
    ks = jax.random.split(key, 5)
    # Canonical small shape from the module: batch=2, in_ch=4, out_ch=8, L=16.
    _run_case(ks[0], N=2, C_in=4, C_out=8, L=16, kernel_size=3, dilation=2)
    # Multi-chunk tile (head chunk + shifted-read chunks).
    _run_case(ks[1], N=2, C_in=4, C_out=8, L=2500, kernel_size=3, dilation=2)
    # Wider channels -> fused MXU contraction path.
    _run_case(ks[2], N=2, C_in=16, C_out=64, L=200, kernel_size=3, dilation=1)
    # Multiple time tiles + batch-row packing + real (non-zero) history gather.
    _run_case(ks[3], N=2, C_in=4, C_out=8, L=25000, kernel_size=3, dilation=2)
    # kernel_size=1 (pad == 0) corner case.
    _run_case(ks[4], N=2, C_in=4, C_out=8, L=300, kernel_size=1, dilation=1)
    print("KERNEL_OK")
</pallas_src>

<mosaic_0001>
module attributes {stable_mosaic.version = 11 : i64} {
  func.func @_shifted1d_kernel(%arg0: i32, %arg1: i32, %arg2: memref<1x4x128xf32, #tpu.memory_space<vmem>>, %arg3: memref<1x1x4x4xf32, #tpu.memory_space<vmem>>, %arg4: memref<8x12xf32, #tpu.memory_space<vmem>>, %arg5: memref<8x1xf32, #tpu.memory_space<vmem>>, %arg6: memref<1x8x128xf32, #tpu.memory_space<vmem>>, %arg7: memref<4x132xf32, #tpu.memory_space<vmem>>) attributes {dimension_semantics = [#tpu.dimension_semantics<parallel>, #tpu.dimension_semantics<parallel>], iteration_bounds = array<i64: 2, 1>, scalar_prefetch = 0 : i64, scratch_operands = 1 : i64, tpu.core_type = #tpu.core_type<tc>, window_params = [{transform_indices = @transform_0, window_bounds = array<i64: 1, 4, 128>}, {transform_indices = @transform_1, window_bounds = array<i64: 1, 1, 4, 4>}, {pipeline_mode = #tpu.pipeline_mode<synchronous>, transform_indices = @transform_2, window_bounds = array<i64: 8, 12>}, {pipeline_mode = #tpu.pipeline_mode<synchronous>, transform_indices = @transform_3, window_bounds = array<i64: 8, 1>}, {transform_indices = @transform_4, window_bounds = array<i64: 1, 8, 128>}]} {
    %c0 = arith.constant 0 : index
    %c0_0 = arith.constant 0 : index
    %0 = vector.load %arg5[%c0, %c0_0] : memref<8x1xf32, #tpu.memory_space<vmem>>, vector<8x1xf32>
    %1 = vector.shape_cast %0 : vector<8x1xf32> to vector<8x1xf32>
    %2 = vector.broadcast %1 : vector<8x1xf32> to vector<8x128xf32>
    %c0_1 = arith.constant 0 : index
    %c0_2 = arith.constant 0 : index
    %3 = vector.load %arg4[%c0_1, %c0_2] : memref<8x12xf32, #tpu.memory_space<vmem>>, vector<8x12xf32>
    %c0_3 = arith.constant 0 : index
    %c0_4 = arith.constant 0 : index
    %c0_5 = arith.constant 0 : index
    %c0_6 = arith.constant 0 : index
    %4 = vector.load %arg3[%c0_3, %c0_4, %c0_5, %c0_6] : memref<1x1x4x4xf32, #tpu.memory_space<vmem>>, vector<1x1x4x4xf32>
    %5 = vector.shape_cast %4 : vector<1x1x4x4xf32> to vector<4x4xf32>
    %c0_7 = arith.constant 0 : index
    %c0_8 = arith.constant 0 : index
    %6 = vector.load %arg7[%c0_7, %c0_8] : memref<4x132xf32, #tpu.memory_space<vmem>>, vector<4x4xf32>
    tpu.vector_store %arg7[%c0_7, %c0_8], %5 {strides = array<i32>} : memref<4x132xf32, #tpu.memory_space<vmem>>, vector<4x4xf32>,
    %c0_9 = arith.constant 0 : index
    %c0_10 = arith.constant 0 : index
    %c0_11 = arith.constant 0 : index
    %7 = vector.load %arg2[%c0_9, %c0_10, %c0_11] : memref<1x4x128xf32, #tpu.memory_space<vmem>>, vector<1x4x128xf32>
    %8 = vector.shape_cast %7 : vector<1x4x128xf32> to vector<4x128xf32>
    %c0_12 = arith.constant 0 : index
    %c4 = arith.constant 4 : index
    %9 = vector.load %arg7[%c0_12, %c4] : memref<4x132xf32, #tpu.memory_space<vmem>>, vector<4x128xf32>
    tpu.vector_store %arg7[%c0_12, %c4], %8 {strides = array<i32>} : memref<4x132xf32, #tpu.memory_space<vmem>>, vector<4x128xf32>,
    %c0_13 = arith.constant 0 : index
    %c0_14 = arith.constant 0 : index
    %10 = vector.load %arg7[%c0_13, %c0_14] : memref<4x132xf32, #tpu.memory_space<vmem>>, vector<4x128xf32>
    %c0_15 = arith.constant 0 : index
    %c2 = arith.constant 2 : index
    %11 = vector.load %arg7[%c0_15, %c2] : memref<4x132xf32, #tpu.memory_space<vmem>>, vector<4x128xf32>
    %c0_16 = arith.constant 0 : index
    %c4_17 = arith.constant 4 : index
    %12 = vector.load %arg7[%c0_16, %c4_17] : memref<4x132xf32, #tpu.memory_space<vmem>>, vector<4x128xf32>
    %13 = vector.extract_strided_slice %3 {offsets = [0, 0], sizes = [8, 1], strides = [1, 1]} : vector<8x12xf32> to vector<8x1xf32>
    %14 = vector.extract_strided_slice %10 {offsets = [0, 0], sizes = [1, 128], strides = [1, 1]} : vector<4x128xf32> to vector<1x128xf32>
    %15 = vector.broadcast %13 : vector<8x1xf32> to vector<8x128xf32>
    %16 = vector.broadcast %14 : vector<1x128xf32> to vector<8x128xf32>
    %17 = arith.mulf %15, %16 : vector<8x128xf32>
    %18 = arith.addf %2, %17 : vector<8x128xf32>
    %19 = vector.extract_strided_slice %3 {offsets = [0, 1], sizes = [8, 1], strides = [1, 1]} : vector<8x12xf32> to vector<8x1xf32>
    %20 = vector.extract_strided_slice %10 {offsets = [1, 0], sizes = [1, 128], strides = [1, 1]} : vector<4x128xf32> to vector<1x128xf32>
    %21 = vector.broadcast %19 : vector<8x1xf32> to vector<8x128xf32>
    %22 = vector.broadcast %20 : vector<1x128xf32> to vector<8x128xf32>
    %23 = arith.mulf %21, %22 : vector<8x128xf32>
    %24 = arith.addf %18, %23 : vector<8x128xf32>
    %25 = vector.extract_strided_slice %3 {offsets = [0, 2], sizes = [8, 1], strides = [1, 1]} : vector<8x12xf32> to vector<8x1xf32>
    %26 = vector.extract_strided_slice %10 {offsets = [2, 0], sizes = [1, 128], strides = [1, 1]} : vector<4x128xf32> to vector<1x128xf32>
    %27 = vector.broadcast %25 : vector<8x1xf32> to vector<8x128xf32>
    %28 = vector.broadcast %26 : vector<1x128xf32> to vector<8x128xf32>
    %29 = arith.mulf %27, %28 : vector<8x128xf32>
    %30 = arith.addf %24, %29 : vector<8x128xf32>
    %31 = vector.extract_strided_slice %3 {offsets = [0, 3], sizes = [8, 1], strides = [1, 1]} : vector<8x12xf32> to vector<8x1xf32>
    %32 = vector.extract_strided_slice %10 {offsets = [3, 0], sizes = [1, 128], strides = [1, 1]} : vector<4x128xf32> to vector<1x128xf32>
    %33 = vector.broadcast %31 : vector<8x1xf32> to vector<8x128xf32>
    %34 = vector.broadcast %32 : vector<1x128xf32> to vector<8x128xf32>
    %35 = arith.mulf %33, %34 : vector<8x128xf32>
    %36 = arith.addf %30, %35 : vector<8x128xf32>
    %37 = vector.extract_strided_slice %3 {offsets = [0, 4], sizes = [8, 1], strides = [1, 1]} : vector<8x12xf32> to vector<8x1xf32>
    %38 = vector.extract_strided_slice %11 {offsets = [0, 0], sizes = [1, 128], strides = [1, 1]} : vector<4x128xf32> to vector<1x128xf32>
    %39 = vector.broadcast %37 : vector<8x1xf32> to vector<8x128xf32>
    %40 = vector.broadcast %38 : vector<1x128xf32> to vector<8x128xf32>
    %41 = arith.mulf %39, %40 : vector<8x128xf32>
    %42 = arith.addf %36, %41 : vector<8x128xf32>
    %43 = vector.extract_strided_slice %3 {offsets = [0, 5], sizes = [8, 1], strides = [1, 1]} : vector<8x12xf32> to vector<8x1xf32>
    %44 = vector.extract_strided_slice %11 {offsets = [1, 0], sizes = [1, 128], strides = [1, 1]} : vector<4x128xf32> to vector<1x128xf32>
    %45 = vector.broadcast %43 : vector<8x1xf32> to vector<8x128xf32>
    %46 = vector.broadcast %44 : vector<1x128xf32> to vector<8x128xf32>
    %47 = arith.mulf %45, %46 : vector<8x128xf32>
    %48 = arith.addf %42, %47 : vector<8x128xf32>
    %49 = vector.extract_strided_slice %3 {offsets = [0, 6], sizes = [8, 1], strides = [1, 1]} : vector<8x12xf32> to vector<8x1xf32>
    %50 = vector.extract_strided_slice %11 {offsets = [2, 0], sizes = [1, 128], strides = [1, 1]} : vector<4x128xf32> to vector<1x128xf32>
    %51 = vector.broadcast %49 : vector<8x1xf32> to vector<8x128xf32>
    %52 = vector.broadcast %50 : vector<1x128xf32> to vector<8x128xf32>
    %53 = arith.mulf %51, %52 : vector<8x128xf32>
    %54 = arith.addf %48, %53 : vector<8x128xf32>
    %55 = vector.extract_strided_slice %3 {offsets = [0, 7], sizes = [8, 1], strides = [1, 1]} : vector<8x12xf32> to vector<8x1xf32>
    %56 = vector.extract_strided_slice %11 {offsets = [3, 0], sizes = [1, 128], strides = [1, 1]} : vector<4x128xf32> to vector<1x128xf32>
    %57 = vector.broadcast %55 : vector<8x1xf32> to vector<8x128xf32>
    %58 = vector.broadcast %56 : vector<1x128xf32> to vector<8x128xf32>
    %59 = arith.mulf %57, %58 : vector<8x128xf32>
    %60 = arith.addf %54, %59 : vector<8x128xf32>
    %61 = vector.extract_strided_slice %3 {offsets = [0, 8], sizes = [8, 1], strides = [1, 1]} : vector<8x12xf32> to vector<8x1xf32>
    %62 = vector.extract_strided_slice %12 {offsets = [0, 0], sizes = [1, 128], strides = [1, 1]} : vector<4x128xf32> to vector<1x128xf32>
    %63 = vector.broadcast %61 : vector<8x1xf32> to vector<8x128xf32>
    %64 = vector.broadcast %62 : vector<1x128xf32> to vector<8x128xf32>
    %65 = arith.mulf %63, %64 : vector<8x128xf32>
    %66 = arith.addf %60, %65 : vector<8x128xf32>
    %67 = vector.extract_strided_slice %3 {offsets = [0, 9], sizes = [8, 1], strides = [1, 1]} : vector<8x12xf32> to vector<8x1xf32>
    %68 = vector.extract_strided_slice %12 {offsets = [1, 0], sizes = [1, 128], strides = [1, 1]} : vector<4x128xf32> to vector<1x128xf32>
    %69 = vector.broadcast %67 : vector<8x1xf32> to vector<8x128xf32>
    %70 = vector.broadcast %68 : vector<1x128xf32> to vector<8x128xf32>
    %71 = arith.mulf %69, %70 : vector<8x128xf32>
    %72 = arith.addf %66, %71 : vector<8x128xf32>
    %73 = vector.extract_strided_slice %3 {offsets = [0, 10], sizes = [8, 1], strides = [1, 1]} : vector<8x12xf32> to vector<8x1xf32>
    %74 = vector.extract_strided_slice %12 {offsets = [2, 0], sizes = [1, 128], strides = [1, 1]} : vector<4x128xf32> to vector<1x128xf32>
    %75 = vector.broadcast %73 : vector<8x1xf32> to vector<8x128xf32>
    %76 = vector.broadcast %74 : vector<1x128xf32> to vector<8x128xf32>
    %77 = arith.mulf %75, %76 : vector<8x128xf32>
    %78 = arith.addf %72, %77 : vector<8x128xf32>
    %79 = vector.extract_strided_slice %3 {offsets = [0, 11], sizes = [8, 1], strides = [1, 1]} : vector<8x12xf32> to vector<8x1xf32>
    %80 = vector.extract_strided_slice %12 {offsets = [3, 0], sizes = [1, 128], strides = [1, 1]} : vector<4x128xf32> to vector<1x128xf32>
    %81 = vector.broadcast %79 : vector<8x1xf32> to vector<8x128xf32>
    %82 = vector.broadcast %80 : vector<1x128xf32> to vector<8x128xf32>
    %83 = arith.mulf %81, %82 : vector<8x128xf32>
    %84 = arith.addf %78, %83 : vector<8x128xf32>
    %c0_18 = arith.constant 0 : index
    %c0_19 = arith.constant 0 : index
    %c0_20 = arith.constant 0 : index
    %85 = vector.load %arg6[%c0_18, %c0_19, %c0_20] : memref<1x8x128xf32, #tpu.memory_space<vmem>>, vector<1x8x128xf32>
    %86 = vector.shape_cast %85 : vector<1x8x128xf32> to vector<8x128xf32>
    %87 = vector.shape_cast %84 : vector<8x128xf32> to vector<1x8x128xf32>
    tpu.vector_store %arg6[%c0_18, %c0_19, %c0_20], %87 {strides = array<i32>} : memref<1x8x128xf32, #tpu.memory_space<vmem>>, vector<1x8x128xf32>,
    return
  }
  func.func @transform_0(%arg0: i32, %arg1: i32) -> (i32, i32, i32) {
    %c0_i32 = arith.constant 0 : i32
    %c0_i32_0 = arith.constant 0 : i32
    return %arg0, %c0_i32, %arg1 : i32, i32, i32
  }
  func.func @transform_1(%arg0: i32, %arg1: i32) -> (i32, i32, i32, i32) {
    %c0_i32 = arith.constant 0 : i32
    %c0_i32_0 = arith.constant 0 : i32
    %c0_i32_1 = arith.constant 0 : i32
    return %arg0, %arg1, %c0_i32, %c0_i32_0 : i32, i32, i32, i32
  }
  func.func @transform_2(%arg0: i32, %arg1: i32) -> (i32, i32) {
    %c0_i32 = arith.constant 0 : i32
    %c0_i32_0 = arith.constant 0 : i32
    %c0_i32_1 = arith.constant 0 : i32
    return %c0_i32, %c0_i32_0 : i32, i32
  }
  func.func @transform_3(%arg0: i32, %arg1: i32) -> (i32, i32) {
    %c0_i32 = arith.constant 0 : i32
    %c0_i32_0 = arith.constant 0 : i32
    %c0_i32_1 = arith.constant 0 : i32
    return %c0_i32, %c0_i32_0 : i32, i32
  }
  func.func @transform_4(%arg0: i32, %arg1: i32) -> (i32, i32, i32) {
    %c0_i32 = arith.constant 0 : i32
    %c0_i32_0 = arith.constant 0 : i32
    return %arg0, %c0_i32, %arg1 : i32, i32, i32
  }
}

</mosaic_0001>

<bundles_post_ra>
// kernel: tpu_custom_call.1
= control target key start
LH: loop header
LB: loop body
LE: loop exit
PB: predicated region body
PF: predicated region fallthrough
CT: control target
= control target key end

     0   :  { %9 = vsyncpa [#allocation4], 0  ;;  %s1101_s0 = inlined_call_operand.vmem [shape: f32[2,4,128], index: 0, kind: input, shape index: {}]   ;;  %s1102_s1 = inlined_call_operand.hbm [shape: f32[2,1,4,4], index: 1, kind: input, shape index: {}]   ;;  %s1103_s2 = inlined_call_operand.vmem [shape: f32[8,12], index: 2, kind: input, shape index: {}]   ;;  %s1104_s3 = inlined_call_operand.vmem [shape: f32[8,1], index: 3, kind: input, shape index: {}]   ;;  %s1105_s4 = inlined_call_operand.hbm [shape: f32[2,8,128], index: 4, kind: output, shape index: {}]  }
   0x1   :  { %11 = vsyncpa [#allocation4 + $0x1], 0 }
   0x2   :  { %12 = vsyncpa [#allocation5], 0 }
   0x3   :  { %14 = vsyncpa [#allocation5 + $0x1], 0  ;;  %s889_s15 = smov 0   ;;  %s891_s16 = smov 0  }
   0x4   :  { %s893_s17 = smov 0   ;;  %s895_s18 = smov 0  }
   0x5   :  { %s897_s19 = smov 0   ;;  %s899_s20 = smov 0  }
   0x6 LB: > { %s629_s21 = sadd.s32 4294967295, %s845_s20   ;;  %s630_s22 = sadd.s32 4294967294, %s845_s20   ;;  %s845_s20 = sphi %s899_s20, %s20_s20   ;;  %s841_s19 = sphi %s897_s19, %s1121_s19   ;;  %s837_s18 = sphi %s895_s18, %s1120_s18   ;;  %s833_s17 = sphi %s893_s17, %s1119_s17   ;;  %s829_s16 = sphi %s891_s16, %s1118_s16   ;;  %s825_s15 = sphi %s889_s15, %s1117_s15  }
   0x7   : > { %s32_s23 = sadd.s32 1, %s841_s19  ;;  %s69_s24 = sadd.s32 1, %s833_s17 }
   0x8   : > { %p34_p0 = scmp.ge.s32.totalorder %s32_s23, 2  ;;  %p76_p1 = scmp.ne.s32.totalorder %s833_s17, %s829_s16 }
   0x9   : > { %p77_p2 = scmp.eq.s32.totalorder %s845_s20, 0  ;;  %p82_p3 = scmp.ne.s32.totalorder %s829_s16, %s825_s15 }
   0xa   : > { %s1123_s23 = smov (%p34_p0, %s32_s23), 0  ;;  %p83_p5 = scmp.eq.s32.totalorder %s629_s21, 0 }
   0xb   : > { %p930_p4 = por %p77_p2, %p76_p1  ;;  %s64_s26 = ssub.s32 %s841_s19, %s1123_s23 }
   0xc   : > { %p150_p6 = scmp.eq.s32.totalorder %s629_s21, 1  ;;  %p67_p7 = scmp.eq.s32.totalorder %s64_s26, 0 }
   0xd   : > { %p936_p8 = por %p83_p5, %p82_p3  ;;  %p156_p10 = scmp.eq.s32.totalorder %s630_s22, 1 }
   0xe   : > { %p940_p9 = por %p150_p6, %p76_p1  ;;  %p655_p13 = scmp.lt.s32.totalorder %s845_s20, 2 }
   0xf   : > { %s945_s29 = scalar_select %p67_p7, %s833_s17, %s69_s24  }
  0x10   : > { %s1109_s28 = scalar_select %p940_p9, 1, 0 }
  0x11   : > { %p947_p11 = por %p156_p10, %p82_p3  ;;  %s192_s5 = sand.u32 1, %s833_s17  }
  0x12   : > { %s633_s6 = sshll.u32 %s192_s5, 2  ;;  %s634_s7 = sshll.u32 %s841_s19, 6 }
  0x13   : > { %s1110_s30 = scalar_select %p947_p11, 1, 0 }
  0x14   : > { %s958_s10 = scalar_lea.hbm %s1102_s1, %s634_s7  ;;  %s196_s11 = scalar_lea.vmem [#allocation3], %s633_s6 }
  0x15   : > { %s204_s12 = sshll.u32 %s196_s11, 4  ;;  %p964_p0 = pnand %p655_p13, %p930_p4  ;;  %s960_s12 = int_to_ptr.vmem [resolvable:$true] %s204_s12 }
  0x16   : > { %s193_s14 = scalar_lea.sflag [#allocation4], %s192_s5  ;;  %s733_s21 = scalar_lea.hbm %s958_s10, 64 }
  0x17   : > { %p734_p3 = scmp.ne.s32.totalorder %s958_s10, %s733_s21  ;;  %p735_p5 = pneg %p964_p0 }
  0x18   : > { %s738_s25 = scalar_lea.hbm %s1102_s1, 128  ;;  %p739_p4 = scmp.lt.u32.totalorder %s958_s10, %s1102_s1 }
  0x19   : > { %p736_p6 = pnand %p735_p5, %p734_p3  ;;  %p740_p10 = scmp.lt.u32.totalorder %s738_s25, %s733_s21 }
  0x1a   : > { %p742_p12 = scmp.lt.u32.totalorder %s733_s21, %s958_s10 }
  0x1b   : > { %p737_p7 = pneg %p736_p6  ;;  %p741_p13 = por %p740_p10, %p739_p4 }
  0x1d   : > { %p743_p1 = por %p742_p12, %p741_p13 }
  0x1f   : > { %p744_p2 = pnand %p743_p1, %p737_p7 }
  0x21   : > { %747 = shalt.err (!%p744_p2)
}
  0x22   : > { %s748_s5 = scalar_lea.vmem %s960_s12, 64  ;;  %s847_s7 = smov [#allocation3]  }
  0x23   : > { %p749_p3 = scmp.ne.s32.totalorder %s960_s12, %s748_s5  ;;  %s753_s8 = sshll.u32 %s847_s7, 4  ;;  %s754_s8 = int_to_ptr.vmem [resolvable:$false] %s753_s8 }
  0x24   : > { %s755_s9 = scalar_lea.vmem %s754_s8, 128  ;;  %p756_p9 = scmp.lt.s32.totalorder %s960_s12, %s754_s8 }
  0x25   : > { %p751_p6 = pnand %p749_p3, %p735_p5  ;;  %p757_p4 = scmp.lt.s32.totalorder %s755_s9, %s748_s5 }
  0x27   : > { %p752_p11 = pneg %p751_p6  ;;  %p758_p10 = por %p757_p4, %p756_p9 }
  0x29   : > { %p759_p12 = pnand %p758_p10, %p752_p11 }
  0x2b   : > { %762 = shalt.err (!%p759_p12)
}
  0x2c   : > { %650 = dma.hbm_to_vmem [thread:$0]  (!%p964_p0), %s958_s10, 64, %s960_s12, %s193_s14  }
  0x2d   : > { %p1112_p1 = scmp.lt.s32.totalorder %s845_s20, 3  ;;  %p1113_p2 = scmp.ge.s32.totalorder %s845_s20, 1 }
  0x2f   : > { %p210_p5 = pnand %p1113_p2, %p1112_p1 }
  0x30   : > { %s1000_s11 = sand.u32 (!%p210_p5), 1, %s829_s16  }
  0x31   : > { %213 = sbr.rel (%p210_p5) target bundleno = 358 (0x166), region = 36  ;;  %s636_s21 = sshll.u32 (!%p210_p5), %s1000_s11, 2 }
  0x32   : > { %s216_s22 = scalar_lea.sflag (!%p210_p5), [#allocation4], %s1000_s11  ;;  %s219_s24 = scalar_lea.vmem (!%p210_p5), [#allocation3], %s636_s21 }
  0x38   : > { %816 = dma.done.wait (%p936_p8), %s216_s22, 64  }
  0x39   : > { %818 = vsyncadd (%p936_p8), %s216_s22, 4294967232  ;;  %p251_p9 = scmp.lt.s32.totalorder %s837_s18, 1  ;;  %v848_v0 = vmov 5   ;;  %v849_v1 = vmov 4   ;;  %vm266_vm0 = vcmask 27648   ;;  %v264_v3 = vld [vmem:[%s1103_s2] sm:$0xff]  ;;  %v287_v17 = vlaneseq }
  0x3a   : > { %721 = vset.pattern.permute.xlu1 %v848_v0  ;;  %720 = vset.pattern.permute.xlu0 %v849_v1  ;;  %s850_s27 = smov 4   ;;  %v265_v4 = vld [vmem:[%s219_s24] sm:$0xf]  ;;  %v851_v5 = vmov 6   ;;  %v852_v6 = vmov 8   ;;  %v853_v7 = vmov 7  }
  0x3b   : > { %s252_s10 = scalar_select %p251_p9, %s837_s18, 1  ;;  %359 = vperm.xlu1 %721, %v264_v3   ;;  %267 = vst.msk [vmem:[#allocation2] sm:$0xf] %vm266_vm0, %v265_v4  ;;  %v854_v8 = vmov 11   ;;  %v855_v9 = vmov 9   ;;  %v856_v10 = vmov 1  }
  0x3c   : > { %v857_v11 = vmov 10   ;;  %v858_v12 = vmov 0   ;;  %v258_v13 = vld [vmem:[%s1104_s3] sm:$0xff]  ;;  %v859_v14 = vmov 2   ;;  %v860_v15 = vmov 3   ;;  %s861_s8 = smov 126  }
  0x3d   : > { %s638_s12 = sshll.u32 %s252_s10, 2  ;;  %vm276_vm1 = vcmask 1043488   ;;  %vm277_vm2 = vcmask 31748   ;;  %vm273_vm3 = vcmask 31744   ;;  %v288_v20 = vshrl.u32 %v287_v17, 7  ;;  %s862_s9 = smov 124  }
  0x3e   : > { %s257_s25 = scalar_lea.vmem %s1101_s0, %s638_s12  ;;  %vm278_vm4 = vmor %vm277_vm2, %vm276_vm1  ;;  %vm354_vm5 = vcmask 1031168   ;;  %vm469_vm6 = vcmask 1014784   ;;  %s637_s21 = sshll.u32 %s1000_s11, 3 }
  0x3f   : > { %v268_v2 = vld [vmem:[%s257_s25] sm:$0xf]  ;;  %722 = vset.pattern.permute.xlu1 %v851_v5  ;;  %v1019_v21 = vsub.s32 0, %v288_v20  ;;  %v334_v22 = vsub.s32 4, %v288_v20  ;;  %v1021_v23 = vsub.s32 1, %v288_v20  ;;  %v368_v24 = vsub.s32 5, %v288_v20 }
  0x40   : > { %270 = vrot.lane.b32.xlu0 %v268_v2, %s850_s27  ;;  %392 = vperm.xlu1 %722, %v264_v3   ;;  %v1027_v33 = vsub.s32 2, %v288_v20  ;;  %v401_v34 = vsub.s32 6, %v288_v20  ;;  %v1031_v41 = vsub.s32 3, %v288_v20  ;;  %v434_v44 = vsub.s32 7, %v288_v20  ;;  %s640_s22 = sshll.u32 %s837_s18, 7  ;;  %s250_s24 = scalar_lea.vmem [#allocation6], %s637_s21 }
  0x41   : > { %s534_s10 = sshll.u32 %s250_s24, 4  ;;  %s1052_s14 = scalar_lea.hbm %s1105_s4, %s640_s22  ;;  %s1054_s10 = int_to_ptr.vmem [resolvable:$true] %s534_s10 }
  0x42   : > { %s520_s18 = scalar_lea.sflag [#allocation5], %s1000_s11  ;;  %s763_s25 = scalar_lea.vmem %s1054_s10, 128 }
  0x43   : > { %p764_p8 = scmp.ne.s32.totalorder %s1054_s10, %s763_s25  ;;  %p1114_p11 = scmp.ne.s32.totalorder %s1109_s28, 0 }
  0x44   : > { %324 = vperm.xlu0 %720, %v264_v3   ;;  %723 = vset.pattern.permute.xlu1 %v853_v7  ;;  %s863_s26 = smov [#allocation6]  }
  0x45   : > { %425 = vperm.xlu1 %723, %v264_v3   ;;  %p765_p0 = pnand %p764_p8, %p1114_p11  ;;  %s767_s6 = sshll.u32 %s863_s26, 4  ;;  %s768_s6 = int_to_ptr.vmem [resolvable:$false] %s767_s6 }
  0x46   : > { %s769_s27 = scalar_lea.vmem %s768_s6, 256  ;;  %p770_p13 = scmp.lt.s32.totalorder %s1054_s10, %s768_s6 }
  0x47   : > { %p766_p7 = pneg %p765_p0  ;;  %p771_p3 = scmp.lt.s32.totalorder %s769_s27, %s763_s25 }
  0x48   : > { %724 = vset.pattern.permute.xlu0 %v852_v6 }
  0x49   : > { %458 = vperm.xlu0 %724, %v264_v3   ;;  %725 = vset.pattern.permute.xlu1 %v855_v9  ;;  %p772_p6 = por %p771_p3, %p770_p13 }
  0x4a   : > { %474 = vperm.xlu1 %725, %v264_v3  }
  0x4b   : > { %p773_p4 = pnand %p772_p6, %p766_p7 }
  0x4d   : > { %727 = vset.pattern.permute.xlu0 %v854_v8 }
  0x4e   : > { %504 = vperm.xlu0 %727, %v264_v3   ;;  %726 = vset.pattern.permute.xlu1 %v857_v11 }
  0x4f   : > { %489 = vperm.xlu1 %726, %v264_v3  }
  0x52   : > { %729 = vset.pattern.permute.xlu0 %v856_v10 }
  0x53   : > { %294 = vperm.xlu0 %729, %v264_v3   ;;  %728 = vset.pattern.permute.xlu1 %v858_v12 }
  0x54   : > { %284 = vperm.xlu1 %728, %v264_v3  }
  0x57   : > { %732 = vset.pattern.permute.xlu0 %v854_v8 }
  0x58   : > { %261 = vperm.xlu1 %728, %v258_v13  }
  0x5c   : > { %730 = vset.pattern.permute.xlu1 %v859_v14 }
  0x5d   : > { %304 = vperm.xlu1 %730, %v264_v3  }
  0x61   : > { %731 = vset.pattern.permute.xlu1 %v860_v15 }
  0x62   : > { %314 = vperm.xlu1 %731, %v264_v3  }
  0xb2   : > { %v271_v16 = vpop.permute.xlu0 %270 }
  0xb3   : > { %v272_v18 = vrot.slane %v271_v16, 4 }
  0xb5   : > { %v274_v19 = vsel %vm273_vm3, %v272_v18, %v271_v16 }
  0xb6   : > { %279 = vst.msk [vmem:[#allocation2] sm:$0xff] %vm278_vm4, %v274_v19 }
  0xba   : > { %v360_v28 = vpop.permute.xlu1 %359 }
  0xbd   : > { %v281_v25 = vld [vmem:[#allocation2] sm:$0xff] }
  0xbe   : > { %v331_v26 = vrot.slane %v281_v25, %v1019_v21  ;;  %v335_v27 = vrot.slane %v281_v25, %v334_v22  ;;  %v365_v29 = vrot.slane %v281_v25, %v1021_v23  ;;  %v369_v30 = vrot.slane %v281_v25, %v368_v24  ;;  %v280_v0 = vld [vmem:[#allocation2] sm:$0xf] }
  0xbf   : > { %v393_v40 = vpop.permute.xlu1 %392  ;;  %v398_v42 = vrot.slane %v281_v25, %v1027_v33  ;;  %v402_v43 = vrot.slane %v281_v25, %v401_v34  ;;  %v431_v47 = vrot.slane %v281_v25, %v1031_v41  ;;  %v435_v51 = vrot.slane %v281_v25, %v434_v44 }
  0xc0   : > { %v341_v31 = vrot.slane %v331_v26, %v1019_v21  ;;  %v345_v32 = vrot.slane %v335_v27, %v1019_v21  ;;  %v375_v36 = vrot.slane %v365_v29, %v1021_v23  ;;  %v379_v37 = vrot.slane %v369_v30, %v1021_v23 }
  0xc1   : > { %v408_v49 = vrot.slane %v398_v42, %v1027_v33  ;;  %v412_v50 = vrot.slane %v402_v43, %v1027_v33  ;;  %v441_v55 = vrot.slane %v431_v47, %v1031_v41  ;;  %v445_v56 = vrot.slane %v435_v51, %v1031_v41 }
  0xc2   : > { %v380_v45 = vmul.f32 %v375_v36, %v360_v28  ;;  %v381_v46 = vmul.f32 %v379_v37, %v360_v28  ;;  %v290_v4 = vrot.slane %v280_v0, %v1019_v21  ;;  %v300_v6 = vrot.slane %v280_v0, %v1021_v23 }
  0xc3   : > { %v325_v35 = vpop.permute.xlu0 %324  ;;  %v413_v52 = vmul.f32 %v408_v49, %v393_v40  ;;  %v414_v53 = vmul.f32 %v412_v50, %v393_v40  ;;  %v310_v16 = vrot.slane %v280_v0, %v1027_v33  ;;  %v320_v20 = vrot.slane %v280_v0, %v1031_v41 }
  0xc4   : > { %v346_v38 = vmul.f32 %v341_v31, %v325_v35  ;;  %v347_v39 = vmul.f32 %v345_v32, %v325_v35  ;;  %v426_v48 = vpop.permute.xlu1 %425 }
  0xc5   : > { %v446_v58 = vmul.f32 %v441_v55, %v426_v48  ;;  %v447_v59 = vmul.f32 %v445_v56, %v426_v48 }
  0xc6   : > { %350 = vrot.lane.b32.xlu0 %v346_v38, %s861_s8  ;;  %352 = vrot.lane.b32.xlu1 %v347_v39, %s861_s8 }
  0xc8   : > { %v459_v54 = vpop.permute.xlu0 %458 }
  0xc9   : > { %v475_v57 = vpop.permute.xlu1 %474  ;;  %v461_v61 = vmul.f32 %v459_v54, %v341_v31  ;;  %v462_v62 = vmul.f32 %v459_v54, %v345_v32 }
  0xca   : > { %384 = vrot.lane.b32.xlu0 %v380_v45, %s861_s8  ;;  %386 = vrot.lane.b32.xlu1 %v381_v46, %s861_s8  ;;  %v477_v1 = vmul.f32 %v475_v57, %v375_v36  ;;  %v478_v2 = vmul.f32 %v475_v57, %v379_v37 }
  0xcd   : > { %v505_v63 = vpop.permute.xlu0 %504 }
  0xce   : > { %417 = vrot.lane.b32.xlu0 %v413_v52, %s861_s8  ;;  %419 = vrot.lane.b32.xlu1 %v414_v53, %s861_s8  ;;  %v490_v60 = vpop.permute.xlu1 %489  ;;  %v507_v14 = vmul.f32 %v505_v63, %v441_v55  ;;  %v508_v15 = vmul.f32 %v505_v63, %v445_v56 }
  0xcf   : > { %v492_v8 = vmul.f32 %v490_v60, %v408_v49  ;;  %v493_v9 = vmul.f32 %v490_v60, %v412_v50 }
  0xd2   : > { %450 = vrot.lane.b32.xlu0 %v446_v58, %s861_s8  ;;  %452 = vrot.lane.b32.xlu1 %v447_v59, %s861_s8  ;;  %v295_v5 = vpop.permute.xlu0 %294 }
  0xd3   : > { %v285_v3 = vpop.permute.xlu1 %284  ;;  %v301_v11 = vmul.f32 %v300_v6, %v295_v5 }
  0xd4   : > { %v291_v7 = vmul.f32 %v290_v4, %v285_v3 }
  0xd6   : > { %465 = vrot.lane.b32.xlu0 %v461_v61, %s862_s9  ;;  %467 = vrot.lane.b32.xlu1 %v462_v62, %s862_s9 }
  0xd7   : > { %v262_v10 = vpop.permute.xlu1 %261 }
  0xd8   : > { %v292_v12 = vadd.f32 %v291_v7, %v262_v10 }
  0xda   : > { %481 = vrot.lane.b32.xlu0 %v477_v1, %s862_s9  ;;  %483 = vrot.lane.b32.xlu1 %v478_v2, %s862_s9  ;;  %v302_v13 = vadd.f32 %v301_v11, %v292_v12 }
  0xdc   : > { %v305_v17 = vpop.permute.xlu1 %304 }
  0xdd   : > { %v311_v18 = vmul.f32 %v310_v16, %v305_v17 }
  0xde   : > { %496 = vrot.lane.b32.xlu0 %v492_v8, %s862_s9  ;;  %498 = vrot.lane.b32.xlu1 %v493_v9, %s862_s9 }
  0xdf   : > { %v312_v19 = vadd.f32 %v311_v18, %v302_v13 }
  0xe1   : > { %v315_v21 = vpop.permute.xlu1 %314 }
  0xe2   : > { %511 = vrot.lane.b32.xlu0 %v507_v14, %s862_s9  ;;  %513 = vrot.lane.b32.xlu1 %v508_v15, %s862_s9  ;;  %v321_v22 = vmul.f32 %v320_v20, %v315_v21 }
  0xe4   : > { %v322_v23 = vadd.f32 %v321_v22, %v312_v19 }
 0x138   : > { %v351_v24 = vpop.permute.xlu0 %350  ;;  %v353_v25 = vpop.permute.xlu1 %352 }
 0x139   : > { %v355_v32 = vsel %vm354_vm5, %v351_v24, %v353_v25 }
 0x13a   : > { %v357_v34 = vadd.f32 %v355_v32, %v322_v23 }
 0x13c   : > { %v385_v26 = vpop.permute.xlu0 %384  ;;  %v387_v27 = vpop.permute.xlu1 %386 }
 0x13d   : > { %v388_v33 = vsel %vm354_vm5, %v385_v26, %v387_v27 }
 0x13e   : > { %v390_v38 = vadd.f32 %v388_v33, %v357_v34 }
 0x140   : > { %v418_v28 = vpop.permute.xlu0 %417  ;;  %v420_v29 = vpop.permute.xlu1 %419 }
 0x141   : > { %v421_v37 = vsel %vm354_vm5, %v418_v28, %v420_v29 }
 0x142   : > { %v423_v40 = vadd.f32 %v421_v37, %v390_v38 }
 0x144   : > { %v451_v30 = vpop.permute.xlu0 %450  ;;  %v453_v31 = vpop.permute.xlu1 %452 }
 0x145   : > { %v454_v39 = vsel %vm354_vm5, %v451_v30, %v453_v31 }
 0x146   : > { %v456_v44 = vadd.f32 %v454_v39, %v423_v40 }
 0x148   : > { %v466_v35 = vpop.permute.xlu0 %465  ;;  %v468_v36 = vpop.permute.xlu1 %467 }
 0x149   : > { %v470_v43 = vsel %vm469_vm6, %v466_v35, %v468_v36 }
 0x14a   : > { %v472_v46 = vadd.f32 %v470_v43, %v456_v44 }
 0x14c   : > { %v482_v41 = vpop.permute.xlu0 %481  ;;  %v484_v42 = vpop.permute.xlu1 %483 }
 0x14d   : > { %v485_v45 = vsel %vm469_vm6, %v482_v41, %v484_v42 }
 0x14e   : > { %v487_v50 = vadd.f32 %v485_v45, %v472_v46 }
 0x150   : > { %v497_v47 = vpop.permute.xlu0 %496  ;;  %v499_v48 = vpop.permute.xlu1 %498 }
 0x151   : > { %v500_v49 = vsel %vm469_vm6, %v497_v47, %v499_v48 }
 0x152   : > { %v502_v51 = vadd.f32 %v500_v49, %v487_v50 }
 0x154   : > { %v512_v52 = vpop.permute.xlu0 %511  ;;  %v514_v53 = vpop.permute.xlu1 %513 }
 0x155   : > { %v515_v54 = vsel %vm469_vm6, %v512_v52, %v514_v53 }
 0x156   : > { %v517_v55 = vadd.f32 %v515_v54, %v502_v51 }
 0x158   : > { %518 = vst [vmem:[%s250_s24] sm:$0xff] %v517_v55 }
 0x159   : > { %776 = shalt.err (!%p773_p4)
}
 0x15a   : > { %s777_s11 = scalar_lea.hbm %s1052_s14, 128  ;;  %s781_s8 = scalar_lea.hbm %s1105_s4, 256 }
 0x15b   : > { %p778_p10 = scmp.ne.s32.totalorder %s1052_s14, %s777_s11  ;;  %p782_p2 = scmp.lt.u32.totalorder %s1052_s14, %s1105_s4 }
 0x15c   : > { %p783_p5 = scmp.lt.u32.totalorder %s781_s8, %s777_s11  ;;  %p785_p8 = scmp.lt.u32.totalorder %s777_s11, %s1052_s14 }
 0x15d   : > { %p779_p12 = pnand %p778_p10, %p1114_p11 }
 0x15e   : > { %p784_p9 = por %p783_p5, %p782_p2 }
 0x15f   : > { %p780_p1 = pneg %p779_p12 }
 0x160   : > { %p786_p0 = por %p785_p8, %p784_p9 }
 0x162   : > { %p787_p7 = pnand %p786_p0, %p780_p1 }
 0x164   : > { %790 = shalt.err (!%p787_p7)
}
 0x165   : > { %645 = dma.vmem_to_hbm [thread:$0]  (%p1114_p11), %s1054_s10, 128, %s1052_s14, %s520_s18  }
 0x166 PF: > { %s546_s22 = sand.u32 1, %s825_s15   ;;  %p1115_p13 = scmp.ne.s32.totalorder %s1110_s30, 0 }
 0x167   : > { %p1116_p3 = scmp.ge.s32.totalorder %s845_s20, 2  ;;  %s547_s24 = scalar_lea.sflag [#allocation5], %s546_s22 }
 0x169   : > { %p652_p6 = pnand %p1116_p3, %p1115_p13 }
 0x16b   : > { %820 = dma.done.wait (!%p652_p6), %s547_s24, 128  }
 0x16c   : > { %822 = vsyncadd (!%p652_p6), %s547_s24, 4294967168  ;;  %s20_s20 = sadd.s32 1, %s845_s20   ;;  %s1117_s15 = smov %s829_s16 }
 0x16d   : > { %p17_p4 = scmp.ge.s32.totalorder %s20_s20, 4   ;;  %s1118_s16 = smov %s833_s17 }
 0x16e   : > { %s1119_s17 = smov %s945_s29  ;;  %s1120_s18 = smov %s841_s19 }
 0x16f   : > { %s1121_s19 = smov %s1123_s23  ;;  %19 = sbr.rel (!%p17_p4) target bundleno = 6 (0x6), region = 84 }
 0x176   :  { %552 = vsyncpa [#allocation4], 1 }
 0x177   :  { %554 = vsyncpa [#allocation4 + $0x1], 1 }
 0x178   :  { %555 = vsyncpa [#allocation5], 1 }
 0x179   :  { %557 = vsyncpa [#allocation5 + $0x1], 1 }

</bundles_post_ra>
